<compile_context>
chip_gen: v7x
topology: tpu7x:2x2x1
jax: 0.10.0
libtpu: 0.0.40
codegen_flags: <defaults>
</compile_context>

<pallas_src>
import functools

import jax
import jax.numpy as jnp
from jax.experimental import pallas as pl
from jax.experimental.pallas import tpu as pltpu


def _round_up(v, m):
    return (v + m - 1) // m * m


# ----------------------------------------------------------------------------
# Shared cell math (runs on padded, lane-aligned tiles).
# ----------------------------------------------------------------------------
def _mlstm_cell(x, h, c, wxm, wmh, wh, bh, hp):
    """One mLSTM cell update.

    x:(bb,Ip) and h:(bb,Hp) in the matmul compute dtype, c:(bb,Hp) f32.
    Returns (hy, cy) in f32. hp (=Hp) is a multiple of 128 so every gate slice
    is lane-aligned.
    """
    cd = wxm.dtype

    # Fused x-side projection: [ wmx(x) | wx(x) ] -> (bb, 5*Hp), f32 accum.
    xw = jnp.dot(x, wxm, preferred_element_type=jnp.float32)

    # m = wmx(x) * wmh(hx)
    m = xw[:, :hp] * jnp.dot(h, wmh, preferred_element_type=jnp.float32)

    # gates = wx(x) + wh(m) + b      (m cast to compute dtype for the MXU)
    gates = (xw[:, hp:]
             + jnp.dot(m.astype(cd), wh, preferred_element_type=jnp.float32)
             + bh)

    def sigmoid(v):                 # logistic via one tanh => 1 EUP op / gate
        return 0.5 * (jnp.tanh(0.5 * v) + 1.0)

    i_g = sigmoid(gates[:, 0 * hp:1 * hp])
    f_g = sigmoid(gates[:, 1 * hp:2 * hp])
    o_g = sigmoid(gates[:, 2 * hp:3 * hp])
    u_g = jnp.tanh(gates[:, 3 * hp:4 * hp])

    cy = f_g * c + i_g * u_g
    hy = o_g * jnp.tanh(cy)
    return hy, cy


# ----------------------------------------------------------------------------
# Kernels
# ----------------------------------------------------------------------------
def mlstm_step_kernel(x_ref, hx_ref, cx_ref, wxm_ref, wmh_ref, wh_ref, bh_ref,
                      hy_ref, cy_ref, *, hp):
    """Single-step mLSTM (one batch block)."""
    hy, cy = _mlstm_cell(x_ref[...], hx_ref[...], cx_ref[...],
                         wxm_ref[...], wmh_ref[...], wh_ref[...], bh_ref[...],
                         hp)
    hy_ref[...] = hy.astype(hy_ref.dtype)
    cy_ref[...] = cy                       # f32 cell state


def mlstm_seq_kernel(x_ref, hx0_ref, cx0_ref, wxm_ref, wmh_ref, wh_ref, bh_ref,
                     hseq_ref, cyT_ref, h_sc, c_sc, *, hp):
    """Whole-sequence mLSTM: grid=(batch_blocks, T); weights resident; state
    carried in VMEM scratch (h in compute dtype, c in f32)."""
    t = pl.program_id(1)

    @pl.when(t == 0)
    def _():
        h_sc[...] = hx0_ref[...]
        c_sc[...] = cx0_ref[...]

    hy, cy = _mlstm_cell(x_ref[...], h_sc[...], c_sc[...],
                         wxm_ref[...], wmh_ref[...], wh_ref[...], bh_ref[...],
                         hp)

    h_sc[...] = hy.astype(h_sc.dtype)      # recurrent h in compute dtype
    c_sc[...] = cy                         # cell state stays f32 across steps
    hseq_ref[...] = hy.astype(hseq_ref.dtype)
    cyT_ref[...] = cy                      # resident; written back once/block


# ----------------------------------------------------------------------------
# One-time parameter preparation
# ----------------------------------------------------------------------------
def prepare_params(params, compute_dtype=jnp.bfloat16):
    """One-time weight prep. Call ONCE, reuse for every step / sequence.

    * transpose to (in, out), per-gate zero-pad H -> Hp (128-lane aligned),
    * fuse the two x-side projections into one (Ip, 5*Hp) weight,
    * cast to `compute_dtype` (default bf16 for the MXU; pass jnp.float32 for
      a validation-only full-precision path). Bias stays f32.
    """
    H, I = params["wmx"].shape             # PyTorch nn.Linear layout: (out,in)
    Hp = _round_up(H, 128)
    Ip = _round_up(I, 128)

    def pad_gate_w(w, in_dim, in_pad):
        # (4H, in_dim) -> (in_pad, 4*Hp), each gate block padded H -> Hp.
        w4 = w.reshape(4, H, in_dim)
        w4 = jnp.pad(w4, ((0, 0), (0, Hp - H), (0, in_pad - in_dim)))
        return w4.reshape(4 * Hp, in_pad).T

    wx_t = pad_gate_w(params["wx"], I, Ip)                          # (Ip, 4Hp)
    wh_t = pad_gate_w(params["wh"], H, Hp)                          # (Hp, 4Hp)
    bh = jnp.pad(params["wh_b"].reshape(4, H), ((0, 0), (0, Hp - H)))
    bh = bh.reshape(1, 4 * Hp).astype(jnp.float32)                  # (1, 4Hp)

    wmx_t = jnp.pad(params["wmx"], ((0, Hp - H), (0, Ip - I))).T    # (Ip, Hp)
    wmh_t = jnp.pad(params["wmh"], ((0, Hp - H), (0, Hp - H))).T    # (Hp, Hp)

    wxm = jnp.concatenate([wmx_t, wx_t], axis=1)                    # (Ip, 5Hp)

    return {
        "wxm": wxm.astype(compute_dtype),
        "wmh_t": wmh_t.astype(compute_dtype),
        "wh_t": wh_t.astype(compute_dtype),
        "bh": bh,
    }


# ----------------------------------------------------------------------------
# Wrapper helpers
# ----------------------------------------------------------------------------
def _pick_bb(B):
    """Batch tile: 256 rows at large B (fills v6e/v7x 256-wide MXU), and for
    16 <= B < 256 split so the grid has >= 2 blocks (v7x megacore sharding)."""
    if B >= 512:
        return 256
    if B >= 256:
        return 128
    if B >= 16:
        return _round_up(_round_up(B, 8) // 2, 8)
    return _round_up(B, 8)


def _vmem_cap_bytes():
    try:
        return int(pltpu.get_tpu_info().vmem_capacity_bytes)
    except Exception:
        return 64 * 1024 * 1024            # conservative: v7x per-TC physical


def _vmem_limit_bytes(bb, Ip, Hp, cd_bytes):
    """Explicit scoped-VMEM budget: single-buffered weights + double-buffered
    activation tiles + epilogue intermediates + headroom, clamped to ~7/8 of
    physical VMEM."""
    weights = (Ip * 5 * Hp + Hp * Hp + Hp * 4 * Hp) * cd_bytes + 4 * Hp * 4
    acts = 2 * bb * (Ip * cd_bytes + 14 * Hp * 4)
    inter = 24 * bb * Hp * 4
    need = weights + acts + inter + (4 << 20)
    return int(min(_vmem_cap_bytes() * 7 // 8, max(need, 32 << 20)))


def _weight_spec(block_shape, index_map):
    """Constant-index weight block: fetched from HBM once per pallas_call and
    kept resident; Buffered(1) drops the useless second (double-) buffer."""
    try:
        return pl.BlockSpec(block_shape, index_map,
                            pipeline_mode=pl.Buffered(1))
    except Exception:                       # pipeline_mode not available
        return pl.BlockSpec(block_shape, index_map)


# ----------------------------------------------------------------------------
# Public entry points
# ----------------------------------------------------------------------------
@jax.jit
def mlstm_step(x, hx, cx, prep):
    """One mLSTM step (the PyTorch module's forward). x:(B,I) hx,cx:(B,H).
    Returns (hy [model dtype], cy [float32])."""
    B, I = x.shape
    H = hx.shape[-1]
    cd = prep["wxm"].dtype
    Ip = prep["wxm"].shape[0]
    Hp = prep["wmh_t"].shape[0]

    bb = _pick_bb(B)
    Bp = _round_up(B, bb)

    # Activations streamed at compute precision; cell state stays f32.
    x_p = jnp.pad(x.astype(cd), ((0, Bp - B), (0, Ip - I)))
    hx_p = jnp.pad(hx.astype(cd), ((0, Bp - B), (0, Hp - H)))
    cx_p = jnp.pad(cx.astype(jnp.float32), ((0, Bp - B), (0, Hp - H)))

    kernel = functools.partial(mlstm_step_kernel, hp=Hp)

    hy_p, cy_p = pl.pallas_call(
        kernel,
        out_shape=(jax.ShapeDtypeStruct((Bp, Hp), cd),
                   jax.ShapeDtypeStruct((Bp, Hp), jnp.float32)),
        grid=(Bp // bb,),
        in_specs=[
            pl.BlockSpec((bb, Ip), lambda i: (i, 0)),          # x
            pl.BlockSpec((bb, Hp), lambda i: (i, 0)),          # hx
            pl.BlockSpec((bb, Hp), lambda i: (i, 0)),          # cx (f32)
            _weight_spec((Ip, 5 * Hp), lambda i: (0, 0)),      # [wmx | wx]
            _weight_spec((Hp, Hp), lambda i: (0, 0)),          # wmh
            _weight_spec((Hp, 4 * Hp), lambda i: (0, 0)),      # wh
            _weight_spec((1, 4 * Hp), lambda i: (0, 0)),       # bias (f32)
        ],
        out_specs=(pl.BlockSpec((bb, Hp), lambda i: (i, 0)),
                   pl.BlockSpec((bb, Hp), lambda i: (i, 0))),
        input_output_aliases={1: 0, 2: 1},                     # hx->hy, cx->cy
        compiler_params=pltpu.CompilerParams(
            dimension_semantics=("parallel",),
            vmem_limit_bytes=_vmem_limit_bytes(bb, Ip, Hp,
                                               jnp.dtype(cd).itemsize)),
    )(x_p, hx_p, cx_p, prep["wxm"], prep["wmh_t"], prep["wh_t"], prep["bh"])

    return hy_p[:B, :H].astype(x.dtype), cy_p[:B, :H]


@jax.jit
def mlstm_sequence(xs, hx, cx, prep):
    """Run the mLSTM over a whole sequence inside ONE pallas_call.

    xs:(T,B,I), hx,cx:(B,H). Returns (hy_seq:(T,B,H) model dtype,
    cy_final:(B,H) float32). Weights are DMA'd HBM->VMEM once per call
    (constant index_map, single-buffered) instead of once per timestep; the
    h/c state is carried in VMEM scratch, so there are no per-step wrapper
    pad/slice copies or HBM state round-trips.
    """
    T, B, I = xs.shape
    H = hx.shape[-1]
    cd = prep["wxm"].dtype
    Ip = prep["wxm"].shape[0]
    Hp = prep["wmh_t"].shape[0]

    bb = _pick_bb(B)
    Bp = _round_up(B, bb)

    # Pad the whole sequence / initial state ONCE (not per step).
    xs_p = jnp.pad(xs.astype(cd), ((0, 0), (0, Bp - B), (0, Ip - I)))
    hx_p = jnp.pad(hx.astype(cd), ((0, Bp - B), (0, Hp - H)))
    cx_p = jnp.pad(cx.astype(jnp.float32), ((0, Bp - B), (0, Hp - H)))

    kernel = functools.partial(mlstm_seq_kernel, hp=Hp)

    hseq_p, cy_p = pl.pallas_call(
        kernel,
        out_shape=(jax.ShapeDtypeStruct((T, Bp, Hp), cd),
                   jax.ShapeDtypeStruct((Bp, Hp), jnp.float32)),
        grid=(Bp // bb, T),                 # batch: parallel, time: arbitrary
        in_specs=[
            pl.BlockSpec((None, bb, Ip), lambda b, t: (t, b, 0)),   # x_t
            pl.BlockSpec((bb, Hp), lambda b, t: (b, 0)),            # hx0
            pl.BlockSpec((bb, Hp), lambda b, t: (b, 0)),            # cx0 (f32)
            _weight_spec((Ip, 5 * Hp), lambda b, t: (0, 0)),        # [wmx | wx]
            _weight_spec((Hp, Hp), lambda b, t: (0, 0)),            # wmh
            _weight_spec((Hp, 4 * Hp), lambda b, t: (0, 0)),        # wh
            _weight_spec((1, 4 * Hp), lambda b, t: (0, 0)),         # bias
        ],
        out_specs=(
            pl.BlockSpec((None, bb, Hp), lambda b, t: (t, b, 0)),   # hy per t
            pl.BlockSpec((bb, Hp), lambda b, t: (b, 0)),            # final cy
        ),
        scratch_shapes=[pltpu.VMEM((bb, Hp), cd),            # h state
                        pltpu.VMEM((bb, Hp), jnp.float32)],  # c state (f32)
        compiler_params=pltpu.CompilerParams(
            dimension_semantics=("parallel", "arbitrary"),
            vmem_limit_bytes=_vmem_limit_bytes(bb, Ip, Hp,
                                               jnp.dtype(cd).itemsize)),
    )(xs_p, hx_p, cx_p, prep["wxm"], prep["wmh_t"], prep["wh_t"], prep["bh"])

    return hseq_p[:, :B, :H].astype(xs.dtype), cy_p[:B, :H]


# ----------------------------------------------------------------------------
# Pure-JAX reference
# ----------------------------------------------------------------------------
def mlstm_reference(x, hx, cx, params):
    m = (x @ params["wmx"].T) * (hx @ params["wmh"].T)
    gates = x @ params["wx"].T + m @ params["wh"].T + params["wh_b"]
    H = hx.shape[-1]
    i, f, o, u = (gates[:, 0:H], gates[:, H:2 * H],
                  gates[:, 2 * H:3 * H], gates[:, 3 * H:4 * H])
    i = jax.nn.sigmoid(i)
    f = jax.nn.sigmoid(f)
    o = jax.nn.sigmoid(o)
    u = jnp.tanh(u)
    cy = f * cx + i * u
    hy = o * jnp.tanh(cy)
    return hy, cy


def mlstm_reference_seq(xs, hx, cx, params):
    hs = []
    for t in range(xs.shape[0]):
        hx, cx = mlstm_reference(xs[t], hx, cx, params)
        hs.append(hx)
    return jnp.stack(hs, 0), cx


# ----------------------------------------------------------------------------
# Demo / validation
# ----------------------------------------------------------------------------
if __name__ == "__main__":
    B, I, H, T = 8, 32, 32, 6   # batch, input_size, hidden_size, seq_len

    key = jax.random.PRNGKey(0)
    ks = jax.random.split(key, 9)
    dt = jnp.float32

    # Deterministic params (PyTorch nn.Linear weight layout: (out, in)).
    params = {
        "wx":   jax.random.normal(ks[0], (4 * H, I), dt) * 0.1,
        "wh":   jax.random.normal(ks[1], (4 * H, H), dt) * 0.1,
        "wh_b": jax.random.normal(ks[2], (4 * H,), dt) * 0.1,
        "wmx":  jax.random.normal(ks[3], (H, I), dt) * 0.1,
        "wmh":  jax.random.normal(ks[4], (H, H), dt) * 0.1,
    }

    x = jax.random.normal(ks[5], (B, I), dt)
    hx = jax.random.normal(ks[6], (B, H), dt)
    cx = jax.random.normal(ks[7], (B, H), dt)
    xs = jax.random.normal(ks[8], (T, B, I), dt) * 0.5

    hy_ref, cy_ref = mlstm_reference(x, hx, cx, params)
    hseq_ref, cyT_ref = mlstm_reference_seq(xs, hx, cx, params)

    # --- f32 weight path (validation only): must match tightly -------------
    prep32 = prepare_params(params, compute_dtype=jnp.float32)

    hy, cy = mlstm_step(x, hx, cx, prep32)
    jax.block_until_ready((hy, cy))
    assert jnp.allclose(hy, hy_ref, atol=1e-5, rtol=1e-5)
    assert jnp.allclose(cy, cy_ref, atol=1e-5, rtol=1e-5)

    hseq, cyT = mlstm_sequence(xs, hx, cx, prep32)
    jax.block_until_ready((hseq, cyT))
    assert jnp.allclose(hseq, hseq_ref, atol=2e-4, rtol=2e-4)
    assert jnp.allclose(cyT, cyT_ref, atol=2e-4, rtol=2e-4)

    # --- default bf16 weight path (f32 accum + f32 gate/cell math) ---------
    prep16 = prepare_params(params)   # compute_dtype defaults to bf16

    hy16, cy16 = mlstm_step(x, hx, cx, prep16)
    hs16, cT16 = mlstm_sequence(xs, hx, cx, prep16)
    jax.block_until_ready((hy16, cy16, hs16, cT16))
    assert jnp.allclose(hy16, hy_ref, atol=5e-2, rtol=5e-2)
    assert jnp.allclose(cy16, cy_ref, atol=5e-2, rtol=5e-2)
    assert jnp.allclose(hs16, hseq_ref, atol=1e-1, rtol=1e-1)
    assert jnp.allclose(cT16, cyT_ref, atol=1e-1, rtol=1e-1)

    print("KERNEL_OK")
</pallas_src>

<mosaic_0001>
module attributes {stable_mosaic.version = 11 : i64} {
  func.func @mlstm_step_kernel(%arg0: i32, %arg1: memref<8x128xf32, #tpu.memory_space<vmem>>, %arg2: memref<8x128xf32, #tpu.memory_space<vmem>>, %arg3: memref<8x128xf32, #tpu.memory_space<vmem>>, %arg4: memref<128x640xf32, #tpu.memory_space<vmem>>, %arg5: memref<128x128xf32, #tpu.memory_space<vmem>>, %arg6: memref<128x512xf32, #tpu.memory_space<vmem>>, %arg7: memref<1x512xf32, #tpu.memory_space<vmem>>, %arg8: memref<8x128xf32, #tpu.memory_space<vmem>>, %arg9: memref<8x128xf32, #tpu.memory_space<vmem>>) attributes {dimension_semantics = [#tpu.dimension_semantics<parallel>], iteration_bounds = array<i64: 1>, scalar_prefetch = 0 : i64, scratch_operands = 0 : i64, tpu.core_type = #tpu.core_type<tc>, window_params = [{transform_indices = @transform_0, window_bounds = array<i64: 8, 128>}, {transform_indices = @transform_1, window_bounds = array<i64: 8, 128>}, {transform_indices = @transform_2, window_bounds = array<i64: 8, 128>}, {pipeline_mode = #tpu.pipeline_mode<synchronous>, transform_indices = @transform_3, window_bounds = array<i64: 128, 640>}, {pipeline_mode = #tpu.pipeline_mode<synchronous>, transform_indices = @transform_4, window_bounds = array<i64: 128, 128>}, {pipeline_mode = #tpu.pipeline_mode<synchronous>, transform_indices = @transform_5, window_bounds = array<i64: 128, 512>}, {pipeline_mode = #tpu.pipeline_mode<synchronous>, transform_indices = @transform_6, window_bounds = array<i64: 1, 512>}, {transform_indices = @transform_7, window_bounds = array<i64: 8, 128>}, {transform_indices = @transform_8, window_bounds = array<i64: 8, 128>}]} {
    %c0 = arith.constant 0 : index
    %c0_0 = arith.constant 0 : index
    %0 = vector.load %arg1[%c0, %c0_0] : memref<8x128xf32, #tpu.memory_space<vmem>>, vector<8x128xf32>
    %c0_1 = arith.constant 0 : index
    %c0_2 = arith.constant 0 : index
    %1 = vector.load %arg2[%c0_1, %c0_2] : memref<8x128xf32, #tpu.memory_space<vmem>>, vector<8x128xf32>
    %c0_3 = arith.constant 0 : index
    %c0_4 = arith.constant 0 : index
    %2 = vector.load %arg3[%c0_3, %c0_4] : memref<8x128xf32, #tpu.memory_space<vmem>>, vector<8x128xf32>
    %c0_5 = arith.constant 0 : index
    %c0_6 = arith.constant 0 : index
    %3 = vector.load %arg4[%c0_5, %c0_6] : memref<128x640xf32, #tpu.memory_space<vmem>>, vector<128x640xf32>
    %c0_7 = arith.constant 0 : index
    %c0_8 = arith.constant 0 : index
    %4 = vector.load %arg5[%c0_7, %c0_8] : memref<128x128xf32, #tpu.memory_space<vmem>>, vector<128x128xf32>
    %c0_9 = arith.constant 0 : index
    %c0_10 = arith.constant 0 : index
    %5 = vector.load %arg6[%c0_9, %c0_10] : memref<128x512xf32, #tpu.memory_space<vmem>>, vector<128x512xf32>
    %c0_11 = arith.constant 0 : index
    %c0_12 = arith.constant 0 : index
    %6 = vector.load %arg7[%c0_11, %c0_12] : memref<1x512xf32, #tpu.memory_space<vmem>>, vector<1x512xf32>
    %cst = arith.constant dense<0.000000e+00> : vector<8x640xf32>
    %7 = tpu.matmul %0, %3, %cst {dimension_numbers = #tpu.dot_dimension_numbers<[1], [0], [0], [1], [0, 0, 1, 1], [], []>} : vector<8x128xf32>, vector<128x640xf32>, vector<8x640xf32> -> vector<8x640xf32>
    %8 = vector.extract_strided_slice %7 {offsets = [0, 0], sizes = [8, 128], strides = [1, 1]} : vector<8x640xf32> to vector<8x128xf32>
    %cst_13 = arith.constant dense<0.000000e+00> : vector<8x128xf32>
    %9 = tpu.matmul %1, %4, %cst_13 {dimension_numbers = #tpu.dot_dimension_numbers<[1], [0], [0], [1], [0, 0, 1, 1], [], []>} : vector<8x128xf32>, vector<128x128xf32>, vector<8x128xf32> -> vector<8x128xf32>
    %10 = arith.mulf %8, %9 : vector<8x128xf32>
    %11 = vector.extract_strided_slice %7 {offsets = [0, 128], sizes = [8, 512], strides = [1, 1]} : vector<8x640xf32> to vector<8x512xf32>
    %cst_14 = arith.constant dense<0.000000e+00> : vector<8x512xf32>
    %12 = tpu.matmul %10, %5, %cst_14 {dimension_numbers = #tpu.dot_dimension_numbers<[1], [0], [0], [1], [0, 0, 1, 1], [], []>} : vector<8x128xf32>, vector<128x512xf32>, vector<8x512xf32> -> vector<8x512xf32>
    %13 = arith.addf %11, %12 : vector<8x512xf32>
    %14 = vector.broadcast %6 : vector<1x512xf32> to vector<8x512xf32>
    %15 = arith.addf %13, %14 : vector<8x512xf32>
    %16 = vector.extract_strided_slice %15 {offsets = [0, 0], sizes = [8, 128], strides = [1, 1]} : vector<8x512xf32> to vector<8x128xf32>
    %cst_15 = arith.constant 5.000000e-01 : f32
    %17 = vector.broadcast %cst_15 : f32 to vector<8x128xf32>
    %18 = arith.mulf %17, %16 : vector<8x128xf32>
    %19 = math.tanh %18 : vector<8x128xf32>
    %cst_16 = arith.constant 1.000000e+00 : f32
    %20 = vector.broadcast %cst_16 : f32 to vector<8x128xf32>
    %21 = arith.addf %19, %20 : vector<8x128xf32>
    %cst_17 = arith.constant 5.000000e-01 : f32
    %22 = vector.broadcast %cst_17 : f32 to vector<8x128xf32>
    %23 = arith.mulf %22, %21 : vector<8x128xf32>
    %24 = vector.extract_strided_slice %15 {offsets = [0, 128], sizes = [8, 128], strides = [1, 1]} : vector<8x512xf32> to vector<8x128xf32>
    %cst_18 = arith.constant 5.000000e-01 : f32
    %25 = vector.broadcast %cst_18 : f32 to vector<8x128xf32>
    %26 = arith.mulf %25, %24 : vector<8x128xf32>
    %27 = math.tanh %26 : vector<8x128xf32>
    %cst_19 = arith.constant 1.000000e+00 : f32
    %28 = vector.broadcast %cst_19 : f32 to vector<8x128xf32>
    %29 = arith.addf %27, %28 : vector<8x128xf32>
    %cst_20 = arith.constant 5.000000e-01 : f32
    %30 = vector.broadcast %cst_20 : f32 to vector<8x128xf32>
    %31 = arith.mulf %30, %29 : vector<8x128xf32>
    %32 = vector.extract_strided_slice %15 {offsets = [0, 256], sizes = [8, 128], strides = [1, 1]} : vector<8x512xf32> to vector<8x128xf32>
    %cst_21 = arith.constant 5.000000e-01 : f32
    %33 = vector.broadcast %cst_21 : f32 to vector<8x128xf32>
    %34 = arith.mulf %33, %32 : vector<8x128xf32>
    %35 = math.tanh %34 : vector<8x128xf32>
    %cst_22 = arith.constant 1.000000e+00 : f32
    %36 = vector.broadcast %cst_22 : f32 to vector<8x128xf32>
    %37 = arith.addf %35, %36 : vector<8x128xf32>
    %cst_23 = arith.constant 5.000000e-01 : f32
    %38 = vector.broadcast %cst_23 : f32 to vector<8x128xf32>
    %39 = arith.mulf %38, %37 : vector<8x128xf32>
    %40 = vector.extract_strided_slice %15 {offsets = [0, 384], sizes = [8, 128], strides = [1, 1]} : vector<8x512xf32> to vector<8x128xf32>
    %41 = math.tanh %40 : vector<8x128xf32>
    %42 = arith.mulf %31, %2 : vector<8x128xf32>
    %43 = arith.mulf %23, %41 : vector<8x128xf32>
    %44 = arith.addf %42, %43 : vector<8x128xf32>
    %45 = math.tanh %44 : vector<8x128xf32>
    %46 = arith.mulf %39, %45 : vector<8x128xf32>
    %c0_24 = arith.constant 0 : index
    %c0_25 = arith.constant 0 : index
    %47 = vector.load %arg8[%c0_24, %c0_25] : memref<8x128xf32, #tpu.memory_space<vmem>>, vector<8x128xf32>
    tpu.vector_store %arg8[%c0_24, %c0_25], %46 {strides = array<i32>} : memref<8x128xf32, #tpu.memory_space<vmem>>, vector<8x128xf32>,
    %c0_26 = arith.constant 0 : index
    %c0_27 = arith.constant 0 : index
    %48 = vector.load %arg9[%c0_26, %c0_27] : memref<8x128xf32, #tpu.memory_space<vmem>>, vector<8x128xf32>
    tpu.vector_store %arg9[%c0_26, %c0_27], %44 {strides = array<i32>} : memref<8x128xf32, #tpu.memory_space<vmem>>, vector<8x128xf32>,
    return
  }
  func.func @transform_0(%arg0: i32) -> (i32, i32) {
    %c0_i32 = arith.constant 0 : i32
    %c0_i32_0 = arith.constant 0 : i32
    return %arg0, %c0_i32 : i32, i32
  }
  func.func @transform_1(%arg0: i32) -> (i32, i32) {
    %c0_i32 = arith.constant 0 : i32
    %c0_i32_0 = arith.constant 0 : i32
    return %arg0, %c0_i32 : i32, i32
  }
  func.func @transform_2(%arg0: i32) -> (i32, i32) {
    %c0_i32 = arith.constant 0 : i32
    %c0_i32_0 = arith.constant 0 : i32
    return %arg0, %c0_i32 : i32, i32
  }
  func.func @transform_3(%arg0: i32) -> (i32, i32) {
    %c0_i32 = arith.constant 0 : i32
    %c0_i32_0 = arith.constant 0 : i32
    %c0_i32_1 = arith.constant 0 : i32
    return %c0_i32, %c0_i32_0 : i32, i32
  }
  func.func @transform_4(%arg0: i32) -> (i32, i32) {
    %c0_i32 = arith.constant 0 : i32
    %c0_i32_0 = arith.constant 0 : i32
    %c0_i32_1 = arith.constant 0 : i32
    return %c0_i32, %c0_i32_0 : i32, i32
  }
  func.func @transform_5(%arg0: i32) -> (i32, i32) {
    %c0_i32 = arith.constant 0 : i32
    %c0_i32_0 = arith.constant 0 : i32
    %c0_i32_1 = arith.constant 0 : i32
    return %c0_i32, %c0_i32_0 : i32, i32
  }
  func.func @transform_6(%arg0: i32) -> (i32, i32) {
    %c0_i32 = arith.constant 0 : i32
    %c0_i32_0 = arith.constant 0 : i32
    %c0_i32_1 = arith.constant 0 : i32
    return %c0_i32, %c0_i32_0 : i32, i32
  }
  func.func @transform_7(%arg0: i32) -> (i32, i32) {
    %c0_i32 = arith.constant 0 : i32
    %c0_i32_0 = arith.constant 0 : i32
    return %arg0, %c0_i32 : i32, i32
  }
  func.func @transform_8(%arg0: i32) -> (i32, i32) {
    %c0_i32 = arith.constant 0 : i32
    %c0_i32_0 = arith.constant 0 : i32
    return %arg0, %c0_i32 : i32, i32
  }
}

</mosaic_0001>

<bundles_post_ra>
// kernel: mlstm_step.1
= control target key start
LH: loop header
LB: loop body
LE: loop exit
PB: predicated region body
PF: predicated region fallthrough
CT: control target
= control target key end

     0   :  { %14 = vsyncpa [#allocation3], 0  ;;  %s1229_s0 = inlined_call_operand.vmem [shape: f32[8,128], index: 0, kind: input, shape index: {}]   ;;  %s1230_s1 = inlined_call_operand.vmem [shape: f32[8,128], index: 1, kind: input, shape index: {}, may-alias: {1,7}]   ;;  %s1231_s2 = inlined_call_operand.vmem [shape: f32[8,128], index: 2, kind: input, shape index: {}, may-alias: {2,8}]   ;;  %s1232_s3 = inlined_call_operand.hbm [shape: f32[128,640], index: 3, kind: input, shape index: {}]   ;;  %s1233_s4 = inlined_call_operand.hbm [shape: f32[128,128], index: 4, kind: input, shape index: {}]   ;;  %s1234_s5 = inlined_call_operand.hbm [shape: f32[128,512], index: 5, kind: input, shape index: {}]   ;;  %s1235_s6 = inlined_call_operand.vmem [shape: f32[1,512], index: 6, kind: input, shape index: {}]   ;;  %s1236_s7 = inlined_call_operand.vmem [shape: f32[8,128], index: 7, kind: output, shape index: {0}, may-alias: {1,7}]   ;;  %s1237_s8 = inlined_call_operand.vmem [shape: f32[8,128], index: 8, kind: output, shape index: {1}, may-alias: {2,8}]  }
   0x1   :  { %15 = vsyncpa [#allocation5], 0  ;;  %s1089_s27 = smov [#allocation4]   ;;  %s1019_s9 = scalar_lea.hbm %s1233_s4, 2048 }
   0x2   :  { %s39_s28 = sshll.u32 %s1089_s27, 4  ;;  %p1020_p0 = scmp.ne.s32.totalorder %s1233_s4, %s1019_s9  ;;  %s40_s28 = int_to_ptr.vmem [resolvable:$true] %s39_s28 }
   0x3   :  { %p1023_p1 = scmp.lt.u32.totalorder %s1019_s9, %s1233_s4 }
   0x5   :  { %p1025_p2 = pnand %p1023_p1, %p1020_p0 }
   0x7   :  { %1028 = shalt.err (!%p1025_p2)
}
   0x8   :  { %s1029_s14 = scalar_lea.vmem %s40_s28, 2048  ;;  %p1034_p4 = scmp.lt.s32.totalorder %s40_s28, %s40_s28 }
   0x9   :  { %p1030_p3 = scmp.ne.s32.totalorder %s40_s28, %s1029_s14  ;;  %p1035_p5 = scmp.lt.s32.totalorder %s1029_s14, %s1029_s14 }
   0xb   :  { %p1036_p6 = por %p1035_p5, %p1034_p4 }
   0xd   :  { %p1037_p7 = pnand %p1036_p6, %p1030_p3 }
   0xf   :  { %1040 = shalt.err (!%p1037_p7)
}
  0x10   :  { %s1090_s15 = smov 128   ;;  %s1091_s16 = smov 8  }
  0x11   :  { %45 = dma.hbm_to_vmem [thread:$0]  %s1233_s4, 2048, %s40_s28, [#allocation5], %s1090_s15, %s1090_s15, %s1091_s16  }
  0x12   :  { %s1092_s19 = smov [#allocation2]   ;;  %s1041_s23 = scalar_lea.hbm %s1232_s3, 10240 }
  0x13   :  { %s27_s20 = sshll.u32 %s1092_s19, 4  ;;  %p1042_p8 = scmp.ne.s32.totalorder %s1232_s3, %s1041_s23  ;;  %s28_s20 = int_to_ptr.vmem [resolvable:$true] %s27_s20 }
  0x14   :  { %p1045_p9 = scmp.lt.u32.totalorder %s1041_s23, %s1232_s3 }
  0x16   :  { %p1047_p10 = pnand %p1045_p9, %p1042_p8 }
  0x18   :  { %1050 = shalt.err (!%p1047_p10)
}
  0x19   :  { %s1051_s29 = scalar_lea.vmem %s28_s20, 10240  ;;  %p1056_p12 = scmp.lt.s32.totalorder %s28_s20, %s28_s20 }
  0x1a   :  { %p1052_p11 = scmp.ne.s32.totalorder %s28_s20, %s1051_s29  ;;  %p1057_p13 = scmp.lt.s32.totalorder %s1051_s29, %s1051_s29 }
  0x1c   :  { %p1058_p0 = por %p1057_p13, %p1056_p12 }
  0x1e   :  { %p1059_p1 = pnand %p1058_p0, %p1052_p11 }
  0x20   :  { %1062 = shalt.err (!%p1059_p1)
}
  0x21   :  { %s1093_s4 = smov 640   ;;  %s1094_s28 = smov 40  }
  0x22   :  { %33 = dma.hbm_to_vmem [thread:$0]  %s1232_s3, 10240, %s28_s20, [#allocation3], %s1093_s4, %s1093_s4, %s1094_s28  }
  0x23   :  { %s1095_s10 = smov [#allocation6]   ;;  %s1063_s14 = scalar_lea.hbm %s1234_s5, 8192 }
  0x24   :  { %s51_s11 = sshll.u32 %s1095_s10, 4  ;;  %p1064_p2 = scmp.ne.s32.totalorder %s1234_s5, %s1063_s14  ;;  %s52_s11 = int_to_ptr.vmem [resolvable:$true] %s51_s11 }
  0x25   :  { %p1067_p3 = scmp.lt.u32.totalorder %s1063_s14, %s1234_s5 }
  0x27   :  { %p1069_p4 = pnand %p1067_p3, %p1064_p2 }
  0x29   :  { %1072 = shalt.err (!%p1069_p4)
}
  0x2a   :  { %s1073_s19 = scalar_lea.vmem %s52_s11, 8192  ;;  %p1078_p6 = scmp.lt.s32.totalorder %s52_s11, %s52_s11 }
  0x2b   :  { %p1074_p5 = scmp.ne.s32.totalorder %s52_s11, %s1073_s19  ;;  %p1079_p7 = scmp.lt.s32.totalorder %s1073_s19, %s1073_s19 }
  0x2d   :  { %p1080_p8 = por %p1079_p7, %p1078_p6 }
  0x2f   :  { %p1081_p9 = pnand %p1080_p8, %p1074_p5 }
  0x31   :  { %1084 = shalt.err (!%p1081_p9)
}
  0x32   :  { %s1096_s3 = smov 512   ;;  %s1097_s20 = smov 32  }
  0x33   :  { %57 = dma.hbm_to_vmem [thread:$0]  %s1234_s5, 8192, %s52_s11, [#allocation5], %s1096_s3, %s1096_s3, %s1097_s20  }
  0x34   :  { %1085 = dma.done.wait [#allocation3], 10240  }
  0x35   :  { %1086 = vsyncadd [#allocation3], 4294957056 }
  0x36   :  { %1087 = dma.done.wait [#allocation5], 10240  }
  0x37   :  { %1088 = vsyncadd [#allocation5], 4294957056  ;;  %v1098_v0 = vmov 0.0   ;;  %v75_v1 = vld [vmem:[#allocation2 + $0x18] sm:$0xff]  ;;  %v80_v2 = vld [vmem:[#allocation2 + $0x40] sm:$0xff]  ;;  %vm1100_vm0 = vmmov 0  }
  0x38   :  { %368 = vmatprep.mubr.f32.mxu1 %v1098_v0  ;;  %297 = vmatprep.mubr.f32.mxu0 %v1098_v0  ;;  %v74_v3 = vld [vmem:[#allocation2 + $0x10] sm:$0xff]  ;;  %v853_v4 = vpack.c.bf16 %v80_v2, %v75_v1  ;;  %v79_v5 = vld [vmem:[#allocation2 + $0x38] sm:$0xff]  ;;  %v85_v6 = vld [vmem:[#allocation2 + $0x68] sm:$0xff] }
  0x39   :  { %v90_v7 = vld [vmem:[#allocation2 + $0x90] sm:$0xff]  ;;  %v855_v8 = vpack.c.bf16 %v79_v5, %v74_v3  ;;  %v84_v10 = vld [vmem:[#allocation2 + $0x60] sm:$0xff]  ;;  %v89_v11 = vld [vmem:[#allocation2 + $0x88] sm:$0xff] }
  0x3a   :  { %v857_v9 = vpack.c.bf16 %v90_v7, %v85_v6  ;;  %v95_v12 = vld [vmem:[#allocation2 + $0xb8] sm:$0xff]  ;;  %854 = vmatprep.subr.bf16.mxu1 %v853_v4  ;;  %v100_v13 = vld [vmem:[#allocation2 + $0xe0] sm:$0xff]  ;;  %v859_v14 = vpack.c.bf16 %v89_v11, %v84_v10  ;;  %v94_v16 = vld [vmem:[#allocation2 + $0xb0] sm:$0xff] }
  0x3b   :  { %856 = vmatpush1.bf16.msra.mxu1 %v855_v8  ;;  %v861_v15 = vpack.c.bf16 %v100_v13, %v95_v12  ;;  %v99_v17 = vld [vmem:[#allocation2 + $0xd8] sm:$0xff]  ;;  %v105_v18 = vld [vmem:[#allocation2 + $0x108] sm:$0xff]  ;;  %v110_v19 = vld [vmem:[#allocation2 + $0x130] sm:$0xff] }
  0x3c   :  { %858 = vmatprep.subr.bf16.mxu1 %v857_v9  ;;  %v863_v20 = vpack.c.bf16 %v99_v17, %v94_v16  ;;  %v865_v21 = vpack.c.bf16 %v110_v19, %v105_v18  ;;  %v104_v22 = vld [vmem:[#allocation2 + $0x100] sm:$0xff]  ;;  %v109_v23 = vld [vmem:[#allocation2 + $0x128] sm:$0xff]  ;;  %v115_v24 = vld [vmem:[#allocation2 + $0x158] sm:$0xff] }
  0x3d   :  { %v120_v25 = vld [vmem:[#allocation2 + $0x180] sm:$0xff]  ;;  %v73_v26 = vld [vmem:[#allocation2 + $0x8] sm:$0xff]  ;;  %v78_v27 = vld [vmem:[#allocation2 + $0x30] sm:$0xff]  ;;  %v867_v30 = vpack.c.bf16 %v109_v23, %v104_v22 }
  0x3e   :  { %v72_v28 = vld [vmem:[#allocation2] sm:$0xff]  ;;  %v77_v29 = vld [vmem:[#allocation2 + $0x28] sm:$0xff]  ;;  %v114_v31 = vld [vmem:[#allocation2 + $0x150] sm:$0xff]  ;;  %v821_v33 = vpack.c.bf16 %v78_v27, %v73_v26  ;;  %v869_v35 = vpack.c.bf16 %v120_v25, %v115_v24 }
  0x3f   :  { %860 = vmatpush1.bf16.msra.mxu1 %v859_v14  ;;  %v119_v32 = vld [vmem:[#allocation2 + $0x178] sm:$0xff]  ;;  %v823_v34 = vpack.c.bf16 %v77_v29, %v72_v28  ;;  %v88_v37 = vld [vmem:[#allocation2 + $0x80] sm:$0xff]  ;;  %v82_v38 = vld [vmem:[#allocation2 + $0x50] sm:$0xff] }
  0x40   :  { %862 = vmatprep.subr.bf16.mxu1 %v861_v15  ;;  %v83_v36 = vld [vmem:[#allocation2 + $0x58] sm:$0xff]  ;;  %v125_v39 = vld [vmem:[#allocation2 + $0x1a8] sm:$0xff]  ;;  %v130_v40 = vld [vmem:[#allocation2 + $0x1d0] sm:$0xff]  ;;  %822 = vmatprep.subr.bf16.mxu0 %v821_v33  ;;  %v871_v46 = vpack.c.bf16 %v119_v32, %v114_v31  ;;  %v1099_v32 = vmov 0.0|0.0  }
  0x41   :  { %v825_v41 = vpack.c.bf16 %v88_v37, %v83_v36  ;;  %v87_v42 = vld [vmem:[#allocation2 + $0x78] sm:$0xff]  ;;  %824 = vmatpush1.bf16.msra.mxu0 %v823_v34  ;;  %v93_v44 = vld [vmem:[#allocation2 + $0xa8] sm:$0xff]  ;;  %v98_v45 = vld [vmem:[#allocation2 + $0xd0] sm:$0xff]  ;;  %v873_v51 = vpack.c.bf16 %v130_v40, %v125_v39 }
  0x42   :  { %v827_v43 = vpack.c.bf16 %v87_v42, %v82_v38  ;;  %v124_v47 = vld [vmem:[#allocation2 + $0x1a0] sm:$0xff]  ;;  %v829_v48 = vpack.c.bf16 %v98_v45, %v93_v44  ;;  %v97_v50 = vld [vmem:[#allocation2 + $0xc8] sm:$0xff]  ;;  %v103_v53 = vld [vmem:[#allocation2 + $0xf8] sm:$0xff] }
  0x43   :  { %864 = vmatpush1.bf16.msra.mxu1 %v863_v20  ;;  %826 = vmatprep.subr.bf16.mxu0 %v825_v41  ;;  %v92_v49 = vld [vmem:[#allocation2 + $0xa0] sm:$0xff]  ;;  %v129_v52 = vld [vmem:[#allocation2 + $0x1c8] sm:$0xff]  ;;  %v135_v55 = vld [vmem:[#allocation2 + $0x1f8] sm:$0xff] }
  0x44   :  { %866 = vmatprep.subr.bf16.mxu1 %v865_v21  ;;  %v108_v54 = vld [vmem:[#allocation2 + $0x120] sm:$0xff]  ;;  %v831_v57 = vpack.c.bf16 %v97_v50, %v92_v49  ;;  %v875_v58 = vpack.c.bf16 %v129_v52, %v124_v47  ;;  %v134_v59 = vld [vmem:[#allocation2 + $0x1f0] sm:$0xff]  ;;  %v107_v62 = vld [vmem:[#allocation2 + $0x118] sm:$0xff] }
  0x45   :  { %v140_v56 = vld [vmem:[#allocation2 + $0x220] sm:$0xff]  ;;  %828 = vmatpush1.bf16.msra.mxu0 %v827_v43  ;;  %v833_v60 = vpack.c.bf16 %v108_v54, %v103_v53  ;;  %v102_v61 = vld [vmem:[#allocation2 + $0xf0] sm:$0xff]  ;;  %v139_v1 = vld [vmem:[#allocation2 + $0x218] sm:$0xff] }
  0x46   :  { %830 = vmatprep.subr.bf16.mxu0 %v829_v48  ;;  %v877_v63 = vpack.c.bf16 %v140_v56, %v135_v55  ;;  %v113_v2 = vld [vmem:[#allocation2 + $0x148] sm:$0xff]  ;;  %v118_v3 = vld [vmem:[#allocation2 + $0x170] sm:$0xff]  ;;  %v835_v6 = vpack.c.bf16 %v107_v62, %v102_v61  ;;  %v879_v7 = vpack.c.bf16 %v139_v1, %v134_v59  ;;  %v144_v8 = vld [vmem:[#allocation2 + $0x240] sm:$0xff] }
  0x47   :  { %868 = vmatpush1.bf16.msra.mxu1 %v867_v30  ;;  %v145_v4 = vld [vmem:[#allocation2 + $0x248] sm:$0xff]  ;;  %v150_v5 = vld [vmem:[#allocation2 + $0x270] sm:$0xff]  ;;  %v837_v9 = vpack.c.bf16 %v118_v3, %v113_v2  ;;  %v112_v10 = vld [vmem:[#allocation2 + $0x140] sm:$0xff] }
  0x48   :  { %870 = vmatprep.subr.bf16.mxu1 %v869_v35  ;;  %v117_v11 = vld [vmem:[#allocation2 + $0x168] sm:$0xff]  ;;  %v881_v12 = vpack.c.bf16 %v150_v5, %v145_v4  ;;  %v123_v14 = vld [vmem:[#allocation2 + $0x198] sm:$0xff]  ;;  %v128_v15 = vld [vmem:[#allocation2 + $0x1c0] sm:$0xff] }
  0x49   :  { %832 = vmatpush1.bf16.msra.mxu0 %v831_v57  ;;  %v149_v13 = vld [vmem:[#allocation2 + $0x268] sm:$0xff]  ;;  %v839_v16 = vpack.c.bf16 %v117_v11, %v112_v10  ;;  %v152_v18 = vld [vmem:[#allocation4] sm:$0xff]  ;;  %v841_v19 = vpack.c.bf16 %v128_v15, %v123_v14  ;;  %v122_v20 = vld [vmem:[#allocation2 + $0x190] sm:$0xff] }
  0x4a   :  { %834 = vmatprep.subr.bf16.mxu0 %v833_v60  ;;  %v883_v17 = vpack.c.bf16 %v149_v13, %v144_v8  ;;  %v127_v21 = vld [vmem:[#allocation2 + $0x1b8] sm:$0xff]  ;;  %v153_v22 = vld [vmem:[#allocation4 + $0x8] sm:$0xff]  ;;  %v138_v24 = vld [vmem:[#allocation2 + $0x210] sm:$0xff] }
  0x4b   :  { %872 = vmatpush1.bf16.msra.mxu1 %v871_v46  ;;  %v133_v23 = vld [vmem:[#allocation2 + $0x1e8] sm:$0xff]  ;;  %v1187_v25 = vld [vmem:[%s1229_s0] sm:$0xff]  ;;  %v843_v26 = vpack.c.bf16 %v127_v21, %v122_v20  ;;  %v910_v27 = vpack.c.bf16 %v153_v22, %v152_v18  ;;  %v132_v30 = vld [vmem:[#allocation2 + $0x1e0] sm:$0xff] }
  0x4c   :  { %874 = vmatprep.subr.bf16.mxu1 %v873_v51  ;;  %v154_v28 = vld [vmem:[#allocation4 + $0x10] sm:$0xff]  ;;  %v845_v29 = vpack.c.bf16 %v138_v24, %v133_v23  ;;  %v137_v31 = vld [vmem:[#allocation2 + $0x208] sm:$0xff]  ;;  %v155_v33 = vld [vmem:[#allocation4 + $0x18] sm:$0xff] }
  0x4d   :  { %836 = vmatpush1.bf16.msra.mxu0 %v835_v6  ;;  %v143_v34 = vld [vmem:[#allocation2 + $0x238] sm:$0xff]  ;;  %v148_v35 = vld [vmem:[#allocation2 + $0x260] sm:$0xff]  ;;  %v847_v36 = vpack.c.bf16 %v137_v31, %v132_v30  ;;  %v913_v37 = vpack.c.bf16 %v155_v33, %v154_v28  ;;  %v142_v39 = vld [vmem:[#allocation2 + $0x230] sm:$0xff] }
  0x4e   :  { %838 = vmatprep.subr.bf16.mxu0 %v837_v9  ;;  %v849_v38 = vpack.c.bf16 %v148_v35, %v143_v34  ;;  %v147_v40 = vld [vmem:[#allocation2 + $0x258] sm:$0xff]  ;;  %v156_v41 = vld [vmem:[#allocation4 + $0x20] sm:$0xff]  ;;  %v157_v42 = vld [vmem:[#allocation4 + $0x28] sm:$0xff] }
  0x4f   :  { %876 = vmatpush1.bf16.msra.mxu1 %v875_v58  ;;  %v851_v43 = vpack.c.bf16 %v147_v40, %v142_v39  ;;  %v916_v44 = vpack.c.bf16 %v157_v42, %v156_v41  ;;  %v76_v45 = vld [vmem:[#allocation2 + $0x20] sm:$0xff]  ;;  %v81_v46 = vld [vmem:[#allocation2 + $0x48] sm:$0xff]  ;;  %v158_v47 = vld [vmem:[#allocation4 + $0x30] sm:$0xff] }
  0x50   :  { %878 = vmatprep.subr.bf16.mxu1 %v877_v63  ;;  %v159_v48 = vld [vmem:[#allocation4 + $0x38] sm:$0xff]  ;;  %v886_v49 = vpack.c.bf16 %v81_v46, %v76_v45  ;;  %v86_v51 = vld [vmem:[#allocation2 + $0x70] sm:$0xff]  ;;  %v160_v53 = vld [vmem:[#allocation4 + $0x40] sm:$0xff] }
  0x51   :  { %840 = vmatpush1.bf16.msra.mxu0 %v839_v16  ;;  %v919_v50 = vpack.c.bf16 %v159_v48, %v158_v47  ;;  %v91_v52 = vld [vmem:[#allocation2 + $0x98] sm:$0xff]  ;;  %v161_v54 = vld [vmem:[#allocation4 + $0x48] sm:$0xff]  ;;  %v96_v57 = vld [vmem:[#allocation2 + $0xc0] sm:$0xff] }
  0x52   :  { %842 = vmatprep.subr.bf16.mxu0 %v841_v19  ;;  %v889_v55 = vpack.c.bf16 %v91_v52, %v86_v51  ;;  %v922_v56 = vpack.c.bf16 %v161_v54, %v160_v53  ;;  %v101_v58 = vld [vmem:[#allocation2 + $0xe8] sm:$0xff]  ;;  %v162_v59 = vld [vmem:[#allocation4 + $0x50] sm:$0xff]  ;;  %v163_v60 = vld [vmem:[#allocation4 + $0x58] sm:$0xff] }
  0x53   :  { %880 = vmatpush1.bf16.msra.mxu1 %v879_v7  ;;  %v892_v61 = vpack.c.bf16 %v101_v58, %v96_v57  ;;  %v925_v62 = vpack.c.bf16 %v163_v60, %v162_v59  ;;  %v106_v63 = vld [vmem:[#allocation2 + $0x110] sm:$0xff]  ;;  %v111_v1 = vld [vmem:[#allocation2 + $0x138] sm:$0xff]  ;;  %v164_v2 = vld [vmem:[#allocation4 + $0x60] sm:$0xff] }
  0x54   :  { %882 = vmatprep.subr.bf16.mxu1 %v881_v12  ;;  %v165_v3 = vld [vmem:[#allocation4 + $0x68] sm:$0xff]  ;;  %v895_v4 = vpack.c.bf16 %v111_v1, %v106_v63  ;;  %v116_v6 = vld [vmem:[#allocation2 + $0x160] sm:$0xff]  ;;  %v166_v8 = vld [vmem:[#allocation4 + $0x70] sm:$0xff] }
  0x55   :  { %844 = vmatpush1.bf16.msra.mxu0 %v843_v26  ;;  %v928_v5 = vpack.c.bf16 %v165_v3, %v164_v2  ;;  %v121_v7 = vld [vmem:[#allocation2 + $0x188] sm:$0xff]  ;;  %v167_v9 = vld [vmem:[#allocation4 + $0x78] sm:$0xff]  ;;  %v126_v12 = vld [vmem:[#allocation2 + $0x1b0] sm:$0xff] }
  0x56   :  { %846 = vmatprep.subr.bf16.mxu0 %v845_v29  ;;  %v898_v10 = vpack.c.bf16 %v121_v7, %v116_v6  ;;  %v931_v11 = vpack.c.bf16 %v167_v9, %v166_v8  ;;  %v131_v13 = vld [vmem:[#allocation2 + $0x1d8] sm:$0xff]  ;;  %v70_v15 = vld [vmem:[%s1230_s1] sm:$0xff]  ;;  %v136_v16 = vld [vmem:[#allocation2 + $0x200] sm:$0xff] }
  0x57   :  { %884 = vmatpush1.bf16.msra.mxu1 %v883_v17  ;;  %v901_v14 = vpack.c.bf16 %v131_v13, %v126_v12  ;;  %v141_v17 = vld [vmem:[#allocation2 + $0x228] sm:$0xff]  ;;  %v146_v19 = vld [vmem:[#allocation2 + $0x250] sm:$0xff]  ;;  %v151_v20 = vld [vmem:[#allocation2 + $0x278] sm:$0xff] }
  0x58   :  { %909 = vmatprep.subr.bf16.mxu1 %v1099_v32  ;;  %v904_v18 = vpack.c.bf16 %v141_v17, %v136_v16  ;;  %v907_v21 = vpack.c.bf16 %v151_v20, %v146_v19  ;;  %v169_v22 = vld [vmem:[#allocation6 + $0x8] sm:$0xff]  ;;  %v171_v24 = vld [vmem:[#allocation6 + $0x18] sm:$0xff]  ;;  %v168_v28 = vld [vmem:[#allocation6] sm:$0xff] }
  0x59   :  { %848 = vmatpush1.bf16.msra.mxu0 %v847_v36  ;;  %v173_v23 = vld [vmem:[#allocation6 + $0x28] sm:$0xff]  ;;  %v172_v29 = vld [vmem:[#allocation6 + $0x20] sm:$0xff]  ;;  %v170_v33 = vld [vmem:[#allocation6 + $0x10] sm:$0xff] }
  0x5a   :  { %369 = vmatmul.mubr.f32.vlgmr.msra.gmra.mrb[0].mxu1 %v1187_v25  ;;  %850 = vmatprep.subr.bf16.mxu0 %v849_v38  ;;  %v933_v26 = vpack.c.bf16 %v173_v23, %v169_v22  ;;  %v935_v31 = vpack.c.bf16 %v172_v29, %v168_v28  ;;  %v174_v34 = vld [vmem:[#allocation6 + $0x30] sm:$0xff]  ;;  %v177_v35 = vld [vmem:[#allocation6 + $0x48] sm:$0xff]  ;;  %v183_v38 = vld [vmem:[#allocation6 + $0x78] sm:$0xff] }
  0x5b   :  { %911 = vmatpush3.bf16.msra.mxu1 %v910_v27  ;;  %818 = vmatprep.mubr.msk.f32.mxu1 %vm1100_vm0, %v1098_v0  ;;  %v175_v27 = vld [vmem:[#allocation6 + $0x38] sm:$0xff]  ;;  %v181_v36 = vld [vmem:[#allocation6 + $0x68] sm:$0xff]  ;;  %v176_v41 = vld [vmem:[#allocation6 + $0x40] sm:$0xff] }
  0x5c   :  { %912 = vmatprep.subr.bf16.mxu1 %v1099_v32  ;;  %v965_v30 = vpack.c.bf16 %v175_v27, %v171_v24  ;;  %v937_v39 = vpack.c.bf16 %v181_v36, %v177_v35  ;;  %v180_v42 = vld [vmem:[#allocation6 + $0x60] sm:$0xff]  ;;  %v182_v45 = vld [vmem:[#allocation6 + $0x70] sm:$0xff]  ;;  %v185_v46 = vld [vmem:[#allocation6 + $0x88] sm:$0xff] }
  0x5d   :  { %852 = vmatpush1.bf16.msra.mxu0 %v851_v43  ;;  %v178_v43 = vld [vmem:[#allocation6 + $0x50] sm:$0xff]  ;;  %v189_v47 = vld [vmem:[#allocation6 + $0xa8] sm:$0xff]  ;;  %v184_v51 = vld [vmem:[#allocation6 + $0x80] sm:$0xff] }
  0x5e   :  { %885 = vmatprep.subr.bf16.mxu0 %v1099_v32  ;;  %v941_v48 = vpack.c.bf16 %v189_v47, %v185_v46  ;;  %v188_v53 = vld [vmem:[#allocation6 + $0xa0] sm:$0xff]  ;;  %v186_v54 = vld [vmem:[#allocation6 + $0x90] sm:$0xff]  ;;  %v193_v57 = vld [vmem:[#allocation6 + $0xc8] sm:$0xff] }
  0x5f   :  { %914 = vmatpush3.bf16.msra.mxu1 %v913_v37  ;;  %v179_v37 = vld [vmem:[#allocation6 + $0x58] sm:$0xff]  ;;  %v197_v58 = vld [vmem:[#allocation6 + $0xe8] sm:$0xff]  ;;  %v196_v63 = vld [vmem:[#allocation6 + $0xe0] sm:$0xff] }
  0x60   :  { %915 = vmatprep.subr.bf16.mxu1 %v1099_v32  ;;  %298 = vmatmul.mubr.f32.vlgmr.msra.gmra.mrb[0].mxu0 %v1187_v25  ;;  %v969_v40 = vpack.c.bf16 %v183_v38, %v179_v37  ;;  %v195_v59 = vld [vmem:[#allocation6 + $0xd8] sm:$0xff]  ;;  %v194_v2 = vld [vmem:[#allocation6 + $0xd0] sm:$0xff]  ;;  %v204_v12 = vld [vmem:[#allocation6 + $0x120] sm:$0xff] }
  0x61   :  { %887 = vmatpush3.bf16.msra.mxu0 %v886_v49  ;;  %783 = vmatprep.mubr.msk.f32.mxu0 %vm1100_vm0, %v1098_v0  ;;  %v187_v49 = vld [vmem:[#allocation6 + $0x98] sm:$0xff]  ;;  %v198_v3 = vld [vmem:[#allocation6 + $0xf0] sm:$0xff]  ;;  %v209_v16 = vld [vmem:[#allocation6 + $0x148] sm:$0xff] }
  0x62   :  { %888 = vmatprep.subr.bf16.mxu0 %v1099_v32  ;;  %v203_v6 = vld [vmem:[#allocation6 + $0x118] sm:$0xff]  ;;  %v979_v9 = vpack.c.bf16 %v198_v3, %v194_v2  ;;  %v202_v13 = vld [vmem:[#allocation6 + $0x110] sm:$0xff]  ;;  %v213_v17 = vld [vmem:[#allocation6 + $0x168] sm:$0xff] }
  0x63   :  { %917 = vmatpush3.bf16.msra.mxu1 %v916_v44  ;;  %v939_v44 = vpack.c.bf16 %v180_v42, %v176_v41  ;;  %v207_v7 = vld [vmem:[#allocation6 + $0x138] sm:$0xff]  ;;  %v953_v22 = vpack.c.bf16 %v213_v17, %v209_v16  ;;  %v208_v23 = vld [vmem:[#allocation6 + $0x140] sm:$0xff]  ;;  %v214_v28 = vld [vmem:[#allocation6 + $0x170] sm:$0xff] }
  0x64   :  { %918 = vmatprep.subr.bf16.mxu1 %v1099_v32  ;;  %v215_v19 = vld [vmem:[#allocation6 + $0x178] sm:$0xff]  ;;  %v212_v24 = vld [vmem:[#allocation6 + $0x160] sm:$0xff]  ;;  %v217_v29 = vld [vmem:[#allocation6 + $0x188] sm:$0xff] }
  0x65   :  { %890 = vmatpush3.bf16.msra.mxu0 %v889_v55  ;;  %v190_v55 = vld [vmem:[#allocation6 + $0xb0] sm:$0xff]  ;;  %v216_v36 = vld [vmem:[#allocation6 + $0x180] sm:$0xff]  ;;  %v225_v41 = vld [vmem:[#allocation6 + $0x1c8] sm:$0xff] }
  0x66   :  { %891 = vmatprep.subr.bf16.mxu0 %v1099_v32  ;;  %v975_v60 = vpack.c.bf16 %v190_v55, %v186_v54  ;;  %v220_v37 = vld [vmem:[#allocation6 + $0x1a0] sm:$0xff]  ;;  %v218_v38 = vld [vmem:[#allocation6 + $0x190] sm:$0xff]  ;;  %v229_v42 = vld [vmem:[#allocation6 + $0x1e8] sm:$0xff] }
  0x67   :  { %920 = vmatpush3.bf16.msra.mxu1 %v919_v50  ;;  %v191_v50 = vld [vmem:[#allocation6 + $0xb8] sm:$0xff]  ;;  %v961_v47 = vpack.c.bf16 %v229_v42, %v225_v41  ;;  %v232_v2 = vld [vmem:[%s1235_s6] sm:$0xf] }
  0x68   :  { %921 = vmatprep.subr.bf16.mxu1 %v1099_v32  ;;  %v973_v52 = vpack.c.bf16 %v191_v50, %v187_v49  ;;  %v228_v49 = vld [vmem:[#allocation6 + $0x1e0] sm:$0xff]  ;;  %v226_v50 = vld [vmem:[#allocation6 + $0x1d0] sm:$0xff] }
  0x69   :  { %893 = vmatpush3.bf16.msra.mxu0 %v892_v61  ;;  %v199_v61 = vld [vmem:[#allocation6 + $0xf8] sm:$0xff] }
  0x6a   :  { %894 = vmatprep.subr.bf16.mxu0 %v1099_v32  ;;  %v977_v1 = vpack.c.bf16 %v199_v61, %v195_v59 }
  0x6b   :  { %923 = vmatpush3.bf16.msra.mxu1 %v922_v56  ;;  %v943_v56 = vpack.c.bf16 %v188_v53, %v184_v51 }
  0x6c   :  { %924 = vmatprep.subr.bf16.mxu1 %v1099_v32 }
  0x6d   :  { %896 = vmatpush3.bf16.msra.mxu0 %v895_v4  ;;  %v201_v4 = vld [vmem:[#allocation6 + $0x108] sm:$0xff] }
  0x6e   :  { %897 = vmatprep.subr.bf16.mxu0 %v1099_v32 }
  0x6f   :  { %926 = vmatpush3.bf16.msra.mxu1 %v925_v62  ;;  %v192_v62 = vld [vmem:[#allocation6 + $0xc0] sm:$0xff] }
  0x70   :  { %927 = vmatprep.subr.bf16.mxu1 %v1099_v32  ;;  %v947_v8 = vpack.c.bf16 %v196_v63, %v192_v62  ;;  %v663_v62 = vlaneseq }
  0x71   :  { %899 = vmatpush3.bf16.msra.mxu0 %v898_v10 }
  0x72   :  { %900 = vmatprep.subr.bf16.mxu0 %v1099_v32  ;;  %v664_v63 = vshrl.u32 %v663_v62, 7 }
  0x73   :  { %929 = vmatpush3.bf16.msra.mxu1 %v928_v5  ;;  %v205_v5 = vld [vmem:[#allocation6 + $0x128] sm:$0xff] }
  0x74   :  { %930 = vmatprep.subr.bf16.mxu1 %v1099_v32  ;;  %v949_v10 = vpack.c.bf16 %v205_v5, %v201_v4  ;;  %v669_v3 = vsub.s32 1, %v664_v63  ;;  %v677_v5 = vsub.s32 3, %v664_v63  ;;  %v673_v17 = vsub.s32 2, %v664_v63 }
  0x75   :  { %902 = vmatpush3.bf16.msra.mxu0 %v901_v14  ;;  %v981_v14 = vpack.c.bf16 %v207_v7, %v203_v6 }
  0x76   :  { %903 = vmatprep.subr.bf16.mxu0 %v1099_v32  ;;  %v678_v16 = vrot.slane %v232_v2, %v677_v5 }
  0x77   :  { %932 = vmatpush3.bf16.msra.mxu1 %v931_v11  ;;  %v200_v11 = vld [vmem:[#allocation6 + $0x100] sm:$0xff] }
  0x78   :  { %966 = vmatprep.subr.bf16.mxu1 %v965_v30  ;;  %v951_v20 = vpack.c.bf16 %v204_v12, %v200_v11  ;;  %v221_v30 = vld [vmem:[#allocation6 + $0x1a8] sm:$0xff] }
  0x79   :  { %905 = vmatpush3.bf16.msra.mxu0 %v904_v18  ;;  %v211_v18 = vld [vmem:[#allocation6 + $0x158] sm:$0xff] }
  0x7a   :  { %819 = vmatmul.mubr.f32.vlgmr.msra.gmra.mrb[2].mxu1 %v70_v15  ;;  %906 = vmatprep.subr.bf16.mxu0 %v1099_v32  ;;  %v967_v32 = vpack.c.bf16 %v174_v34, %v170_v33  ;;  %v206_v15 = vld [vmem:[#allocation6 + $0x130] sm:$0xff]  ;;  %v985_v27 = vpack.c.bf16 %v215_v19, %v211_v18  ;;  %v223_v33 = vld [vmem:[#allocation6 + $0x1b8] sm:$0xff]  ;;  %v955_v34 = vpack.c.bf16 %v212_v24, %v208_v23 }
  0x7b   :  { %651 = vmatprep.mubr.f32.mxu1 %v1098_v0 }
  0x7c   :  { %968 = vmatpush1.bf16.msra.mxu1 %v967_v32  ;;  %v957_v32 = vpack.c.bf16 %v221_v30, %v217_v29 }
  0x7d   :  { %908 = vmatpush3.bf16.msra.mxu0 %v907_v21  ;;  %970 = vmatprep.subr.bf16.mxu1 %v969_v40  ;;  %v983_v21 = vpack.c.bf16 %v206_v15, %v202_v13  ;;  %v222_v40 = vld [vmem:[#allocation6 + $0x1b0] sm:$0xff] }
  0x7e   :  { %934 = vmatprep.subr.bf16.mxu0 %v933_v26  ;;  %v210_v26 = vld [vmem:[#allocation6 + $0x150] sm:$0xff]  ;;  %v991_v46 = vpack.c.bf16 %v222_v40, %v218_v38 }
  0x7f   :  { %v987_v35 = vpack.c.bf16 %v214_v28, %v210_v26 }
  0x80   :  { %784 = vmatmul.mubr.f32.vlgmr.msra.gmra.mrb[2].mxu0 %v1187_v25  ;;  %v971_v25 = vpack.c.bf16 %v182_v45, %v178_v43  ;;  %v227_v43 = vld [vmem:[#allocation6 + $0x1d8] sm:$0xff]  ;;  %v959_v45 = vpack.c.bf16 %v220_v37, %v216_v36 }
  0x81   :  { %936 = vmatpush1.bf16.msra.mxu0 %v935_v31  ;;  %580 = vmatprep.mubr.f32.mxu0 %v1098_v0  ;;  %v945_v0 = vpack.c.bf16 %v197_v58, %v193_v57  ;;  %v219_v31 = vld [vmem:[#allocation6 + $0x198] sm:$0xff] }
  0x82   :  { %938 = vmatprep.subr.bf16.mxu0 %v937_v39  ;;  %972 = vmatpush1.bf16.msra.mxu1 %v971_v25  ;;  %v989_v39 = vpack.c.bf16 %v223_v33, %v219_v31  ;;  %v71_v33 = vld [vmem:[%s1231_s2] sm:$0xff] }
  0x83   :  { %974 = vmatprep.subr.bf16.mxu1 %v973_v52  ;;  %v230_v52 = vld [vmem:[#allocation6 + $0x1f0] sm:$0xff] }
  0x84   :  { %v995_v53 = vpack.c.bf16 %v230_v52, %v226_v50 }
  0x85   :  { %940 = vmatpush1.bf16.msra.mxu0 %v939_v44  ;;  %v231_v44 = vld [vmem:[#allocation6 + $0x1f8] sm:$0xff] }
  0x86   :  { %942 = vmatprep.subr.bf16.mxu0 %v941_v48  ;;  %976 = vmatpush1.bf16.msra.mxu1 %v975_v60  ;;  %v993_v25 = vpack.c.bf16 %v231_v44, %v227_v43  ;;  %v224_v48 = vld [vmem:[#allocation6 + $0x1c0] sm:$0xff] }
  0x87   :  { %978 = vmatprep.subr.bf16.mxu1 %v977_v1  ;;  %v963_v51 = vpack.c.bf16 %v228_v49, %v224_v48  ;;  %v665_v1 = vsub.s32 0, %v664_v63 }
  0x89   :  { %944 = vmatpush1.bf16.msra.mxu0 %v943_v56  ;;  %v666_v4 = vrot.slane %v232_v2, %v665_v1 }
  0x8a   :  { %946 = vmatprep.subr.bf16.mxu0 %v945_v0  ;;  %980 = vmatpush1.bf16.msra.mxu1 %v979_v9 }
  0x8b   :  { %982 = vmatprep.subr.bf16.mxu1 %v981_v14 }
  0x8d   :  { %948 = vmatpush1.bf16.msra.mxu0 %v947_v8  ;;  %v670_v8 = vrot.slane %v232_v2, %v669_v3 }
  0x8e   :  { %950 = vmatprep.subr.bf16.mxu0 %v949_v10  ;;  %984 = vmatpush1.bf16.msra.mxu1 %v983_v21 }
  0x8f   :  { %986 = vmatprep.subr.bf16.mxu1 %v985_v27 }
  0x91   :  { %952 = vmatpush1.bf16.msra.mxu0 %v951_v20 }
  0x92   :  { %954 = vmatprep.subr.bf16.mxu0 %v953_v22  ;;  %988 = vmatpush1.bf16.msra.mxu1 %v987_v35  ;;  %v674_v22 = vrot.slane %v232_v2, %v673_v17 }
  0x93   :  { %990 = vmatprep.subr.bf16.mxu1 %v989_v39 }
  0x95   :  { %956 = vmatpush1.bf16.msra.mxu0 %v955_v34 }
  0x96   :  { %958 = vmatprep.subr.bf16.mxu0 %v957_v32  ;;  %992 = vmatpush1.bf16.msra.mxu1 %v991_v46 }
  0x97   :  { %994 = vmatprep.subr.bf16.mxu1 %v993_v25 }
  0x99   :  { %960 = vmatpush1.bf16.msra.mxu0 %v959_v45 }
  0x9a   :  { %962 = vmatprep.subr.bf16.mxu0 %v961_v47  ;;  %996 = vmatpush1.bf16.msra.mxu1 %v995_v53 }
  0x9d   :  { %964 = vmatpush1.bf16.msra.mxu0 %v963_v51 }
 0x12d   :  { %v370_v54 = vpop.f32.mrb[0].mxu1 }
 0x12e   :  { %v372_v55 = vpop.f32.mrb[1].mxu1 }
 0x133   :  { %v299_v56 = vpop.f32.mrb[0].mxu0 }
 0x134   :  { %v301_v57 = vpop.f32.mrb[1].mxu0 }
 0x14d   :  { %v511_v58 = vpop.f32.mrb[2].mxu1 }
 0x14e   :  { %v515_v59 = vmul.f32 %v511_v58, %v299_v56  ;;  %v820_v60 = vpop.f32.mrb[3].mxu1 }
 0x150   :  { %581 = vmatmul.mubr.f32.vlgmr.msra.gmra.mrb[4].mxu0 %v515_v59  ;;  %652 = vmatmul.mubr.f32.vlgmr.msra.gmra.mrb[4].mxu1 %v515_v59 }
 0x153   :  { %v441_v0 = vpop.f32.mrb[2].mxu0 }
 0x154   :  { %v785_v61 = vpop.f32.mrb[3].mxu0 }
 0x223   :  { %v582_v6 = vpop.f32.mrb[4].mxu0  ;;  %v653_v7 = vpop.f32.mrb[4].mxu1 }
 0x224   :  { %v658_v9 = vadd.f32 %v582_v6, %v301_v57  ;;  %v660_v10 = vadd.f32 %v653_v7, %v372_v55  ;;  %v584_v11 = vpop.f32.mrb[5].mxu0  ;;  %v655_v12 = vpop.f32.mrb[5].mxu1 }
 0x225   :  { %v659_v13 = vadd.f32 %v584_v11, %v370_v54  ;;  %v661_v14 = vadd.f32 %v655_v12, %v441_v0 }
 0x226   :  { %v683_v15 = vadd.f32 %v666_v4, %v658_v9  ;;  %v685_v23 = vadd.f32 %v674_v22, %v660_v10 }
 0x227   :  { %v684_v18 = vadd.f32 %v670_v8, %v659_v13  ;;  %v686_v21 = vadd.f32 %v678_v16, %v661_v14 }
 0x228   :  { %v687_v19 = vmul.f32 0.5, %v683_v15  ;;  %v695_v24 = vmul.f32 0.5, %v685_v23 }
 0x229   :  { %v691_v20 = vmul.f32 0.5, %v684_v18 }
 0x22a   :  { %1009 = vtanh.f32 %v687_v19 }
 0x22b   :  { %1011 = vtanh.f32 %v691_v20 }
 0x22c   :  { %1013 = vtanh.f32 %v686_v21 }
 0x22d   :  { %1015 = vtanh.f32 %v695_v24 }
 0x234   :  { %v1010_v26 = vpop.eup %1009 }
 0x235   :  { %v689_v27 = vadd.f32 1.0, %v1010_v26  ;;  %v1012_v28 = vpop.eup %1011 }
 0x236   :  { %v693_v30 = vadd.f32 1.0, %v1012_v28  ;;  %v1014_v31 = vpop.eup %1013 }
 0x237   :  { %v690_v29 = vmul.f32 0.5, %v689_v27  ;;  %v1016_v37 = vpop.eup %1015 }
 0x238   :  { %v694_v34 = vmul.f32 0.5, %v693_v30  ;;  %v697_v38 = vadd.f32 1.0, %v1016_v37 }
 0x239   :  { %v701_v35 = vmul.f32 %v1014_v31, %v690_v29 }
 0x23a   :  { %v700_v32 = vmul.f32 %v694_v34, %v71_v33  ;;  %v698_v39 = vmul.f32 0.5, %v697_v38 }
 0x23c   :  { %v702_v36 = vadd.f32 %v701_v35, %v700_v32 }
 0x23e   :  { %1017 = vtanh.f32 %v702_v36  ;;  %706 = vst [vmem:[%s1237_s8] sm:$0xff] %v702_v36 }
 0x248   :  { %v1018_v40 = vpop.eup %1017 }
 0x249   :  { %v704_v41 = vmul.f32 %v1018_v40, %v698_v39 }
 0x24b   :  { %705 = vst [vmem:[%s1236_s7] sm:$0xff] %v704_v41 }
 0x24c   :  { %715 = vsyncpa [#allocation3], 1 }
 0x24d   :  { %716 = vsyncpa [#allocation5], 1 }

</bundles_post_ra>
